<compile_context>
chip_gen: v5e
topology: v5e:2x2
jax: 0.10.0
libtpu: 0.0.40
codegen_flags: <defaults>
</compile_context>

<pallas_src>
import functools

import jax
import jax.numpy as jnp
from jax.experimental import pallas as pl
from jax.experimental.pallas import tpu as pltpu

IN_FEATURES = 1033
ALPHA = 50
OUT_FEATURES = 1

_LANE = 128
_SUBLANE = 8


def _round_up(x, m):
    return ((x + m - 1) // m) * m


def widenet_kernel(x_ref, w1_ref, b1_ref, w2_ref, b2_ref, o_ref, *, bf16_matmul):
    # x_ref:  (TB, 1033) VMEM     w1_ref: (1033, alpha) VMEM
    # b1_ref: (1, alpha) VMEM     w2_ref: (1, alpha)    VMEM
    # b2_ref: (1, 1)     SMEM     o_ref:  (TB, 1)       VMEM
    x = x_ref[...]
    w1 = w1_ref[...]

    if bf16_matmul:
        # Single-pass bf16 MXU matmul, f32 accumulation.  The cast is a few
        # hundred VPU cycles per tile and avoids the multi-pass f32 MXU path
        # that would otherwise be the binding unit on v5e/v7x.
        x = x.astype(jnp.bfloat16)
        w1 = w1.astype(jnp.bfloat16)
    h = jnp.dot(x, w1, preferred_element_type=jnp.float32)

    # Bias broadcast + ReLU in f32 (VPU).
    h = jnp.maximum(h + b1_ref[...], 0.0)

    # Layer 2 (alpha -> 1) as a VPU multiply + cross-lane (XLU) reduction:
    # avoids an MXU push/pop for a single useful output column and overlaps
    # with the layer-1 MXU work.
    y = jnp.sum(h * w2_ref[...], axis=-1, keepdims=True)   # (TB, 1), f32
    y = y + b2_ref[0, 0]                                    # scalar bias (SMEM)

    o_ref[...] = y.astype(o_ref.dtype)


@functools.partial(jax.jit, static_argnames=("block_b", "bf16_matmul"))
def _widenet_pallas(x, w1, b1, w2, b2, *, block_b, bf16_matmul):
    B, F = x.shape
    grid = (pl.cdiv(B, block_b),)   # no jnp.pad: last block may be ragged

    # Honest, lane-padded VMEM accounting (double-buffered), capped below the
    # physical VMEM of the current chip so large block_b values stay safe on
    # v7x's 64 MiB as well as v5e/v6e's 128 MiB.
    padded_f = _round_up(IN_FEATURES, _LANE)            # 1033 -> 1152 lanes
    padded_a = _round_up(ALPHA, _LANE)                  # 50   -> 128 lanes
    x_tile_bytes = block_b * padded_f * x.dtype.itemsize
    w_bytes = padded_f * padded_a * w1.dtype.itemsize + 2 * padded_a * 4
    out_tile_bytes = block_b * _LANE * 4
    vmem_needed = 2 * (x_tile_bytes + w_bytes + out_tile_bytes) + (4 << 20)
    try:
        vmem_cap = int(pltpu.get_tpu_info().vmem_capacity_bytes)
    except Exception:
        vmem_cap = 64 << 20                             # conservative (v7x)
    vmem_limit = int(min(max(32 << 20, vmem_needed), vmem_cap - (8 << 20)))

    # Advisory cost estimate: the kernel is bound by streaming x from HBM.
    flops = 2 * B * IN_FEATURES * ALPHA + 2 * B * ALPHA
    bytes_accessed = (B * IN_FEATURES * x.dtype.itemsize
                      + IN_FEATURES * ALPHA * w1.dtype.itemsize
                      + 2 * ALPHA * 4 + 4
                      + B * OUT_FEATURES * 4)

    kernel = functools.partial(widenet_kernel, bf16_matmul=bf16_matmul)
    return pl.pallas_call(
        kernel,
        out_shape=jax.ShapeDtypeStruct((B, OUT_FEATURES), jnp.float32),
        grid_spec=pltpu.PrefetchScalarGridSpec(
            num_scalar_prefetch=0,
            grid=grid,
            in_specs=[
                # x: batch-tiled, full feature extent (1033 == full dim, legal).
                # Out-of-bounds rows in a ragged last block are garbage, but
                # rows are independent and their outputs are masked/discarded.
                pl.BlockSpec((block_b, IN_FEATURES), lambda i: (i, 0)),
                # Weights/biases: constant index_map -> resident across steps.
                pl.BlockSpec((IN_FEATURES, ALPHA), lambda i: (0, 0)),
                pl.BlockSpec((1, ALPHA), lambda i: (0, 0)),
                pl.BlockSpec((1, ALPHA), lambda i: (0, 0)),
                # b2 is a single scalar: keep it out of the VMEM pipeline.
                pl.BlockSpec(memory_space=pltpu.MemorySpace.SMEM),
            ],
            out_specs=pl.BlockSpec((block_b, OUT_FEATURES), lambda i: (i, 0)),
        ),
        compiler_params=pltpu.CompilerParams(
            dimension_semantics=("parallel",),
            vmem_limit_bytes=vmem_limit,
        ),
        cost_estimate=pl.CostEstimate(
            flops=flops, transcendentals=0, bytes_accessed=bytes_accessed),
    )(x, w1, b1, w2, b2)


def widenet_forward(x, w1, b1, w2, b2, block_b=None, bf16_matmul=True):
    B, F = x.shape
    assert F == IN_FEATURES
    assert w1.shape == (IN_FEATURES, ALPHA)
    assert b1.shape == (1, ALPHA)
    assert w2.shape == (1, ALPHA)
    assert b2.shape == (1, OUT_FEATURES)

    try:
        kind = jax.devices()[0].device_kind.lower()
    except Exception:
        kind = ""
    is_v7 = "v7" in kind

    if block_b is None:
        # v7x HBM (~3.2 TB/s) makes 1024-row steps short relative to the
        # ~0.35us/step pipeline overhead -> use 2048 there; 1024 elsewhere
        # sits near the measured HBM roofline sweet spot.  Sweepable.
        block_b = 2048 if is_v7 else 1024

    # Normalize block_b: full extent if >= B, otherwise a multiple of 8
    # (sublane constraint on a partial batch tiling).
    if block_b >= B:
        block_b = B
    else:
        block_b = _round_up(block_b, _SUBLANE)
        if block_b >= B:
            block_b = B

    # v7x has 2 TensorCores: keep >= 2 and an even number of blocks so
    # dimension_semantics=("parallel",) load-balances both cores.
    if is_v7 and B >= 2 * _SUBLANE and block_b < B or (is_v7 and B >= 2 * _SUBLANE and block_b == B):
        nb = -(-B // block_b)
        nb_even = max(2, _round_up(nb, 2))
        cand = _round_up(-(-B // nb_even), _SUBLANE)
        block_b = min(block_b, cand) if block_b < B else cand

    return _widenet_pallas(x, w1, b1, w2, b2,
                           block_b=block_b, bf16_matmul=bf16_matmul)


def init_params(key):
    # Deterministic init mimicking torch.nn.Linear default:
    # U(-1/sqrt(fan_in), 1/sqrt(fan_in)) for weights and biases.
    k1, k2, k3, k4 = jax.random.split(key, 4)
    bound1 = 1.0 / jnp.sqrt(float(IN_FEATURES))
    bound2 = 1.0 / jnp.sqrt(float(ALPHA))
    w1 = jax.random.uniform(k1, (IN_FEATURES, ALPHA), jnp.float32,
                            -bound1, bound1)
    b1 = jax.random.uniform(k2, (1, ALPHA), jnp.float32, -bound1, bound1)
    w2 = jax.random.uniform(k3, (1, ALPHA), jnp.float32, -bound2, bound2)
    b2 = jax.random.uniform(k4, (1, OUT_FEATURES), jnp.float32,
                            -bound2, bound2)
    return w1, b1, w2, b2


def reference_forward(x, w1, b1, w2, b2):
    h = jnp.maximum(x @ w1 + b1, 0.0)
    return h @ w2.T + b2


if __name__ == "__main__":
    key = jax.random.PRNGKey(0)
    kx, kp = jax.random.split(key)

    B = 8  # small demo batch; feature dim is fixed at 1033 by the module
    x = jax.random.normal(kx, (B, IN_FEATURES), jnp.float32)
    w1, b1, w2, b2 = init_params(kp)
    ref = reference_forward(x, w1, b1, w2, b2)

    # Default (bf16 MXU) path: loosened tolerance vs the f32 reference.
    out = widenet_forward(x, w1, b1, w2, b2)
    out = jax.block_until_ready(out)
    assert out.shape == (B, OUT_FEATURES)
    assert jnp.allclose(out, ref, atol=3e-2, rtol=3e-2), "bf16 path mismatch"

    # f32 path: tight agreement with the reference.
    out_f32 = widenet_forward(x, w1, b1, w2, b2, bf16_matmul=False)
    out_f32 = jax.block_until_ready(out_f32)
    assert jnp.allclose(out_f32, ref, atol=1e-4, rtol=1e-4), "f32 path mismatch"

    # Ragged-batch path (no jnp.pad): exercise a partial last block.
    B2 = 10
    x2 = jax.random.normal(kx, (B2, IN_FEATURES), jnp.float32)
    out2 = widenet_forward(x2, w1, b1, w2, b2, block_b=8)
    out2 = jax.block_until_ready(out2)
    ref2 = reference_forward(x2, w1, b1, w2, b2)
    assert out2.shape == (B2, OUT_FEATURES)
    assert jnp.allclose(out2, ref2, atol=3e-2, rtol=3e-2), "ragged-batch mismatch"

    print("KERNEL_OK")
</pallas_src>

<mosaic_0001>
module attributes {stable_mosaic.version = 11 : i64} {
  func.func @widenet_kernel(%arg0: i32, %arg1: memref<8x1033xf32, #tpu.memory_space<vmem>>, %arg2: memref<1033x50xf32, #tpu.memory_space<vmem>>, %arg3: memref<1x50xf32, #tpu.memory_space<vmem>>, %arg4: memref<1x50xf32, #tpu.memory_space<vmem>>, %arg5: memref<1x1xf32, #tpu.memory_space<smem>>, %arg6: memref<8x1xf32, #tpu.memory_space<vmem>>) attributes {dimension_semantics = [#tpu.dimension_semantics<parallel>], iteration_bounds = array<i64: 1>, scalar_prefetch = 0 : i64, scratch_operands = 0 : i64, tpu.core_type = #tpu.core_type<tc>, window_params = [{transform_indices = @transform_0, window_bounds = array<i64: 8, 1033>}, {pipeline_mode = #tpu.pipeline_mode<synchronous>, transform_indices = @transform_1, window_bounds = array<i64: 1033, 50>}, {pipeline_mode = #tpu.pipeline_mode<synchronous>, transform_indices = @transform_2, window_bounds = array<i64: 1, 50>}, {pipeline_mode = #tpu.pipeline_mode<synchronous>, transform_indices = @transform_3, window_bounds = array<i64: 1, 50>}, {transform_indices = @transform_4, window_bounds = array<i64: 1, 1>}, {transform_indices = @transform_5, window_bounds = array<i64: 8, 1>}]} {
    %c0 = arith.constant 0 : index
    %c0_0 = arith.constant 0 : index
    %0 = vector.load %arg1[%c0, %c0_0] : memref<8x1033xf32, #tpu.memory_space<vmem>>, vector<8x1033xf32>
    %c0_1 = arith.constant 0 : index
    %c0_2 = arith.constant 0 : index
    %1 = vector.load %arg2[%c0_1, %c0_2] : memref<1033x50xf32, #tpu.memory_space<vmem>>, vector<1033x50xf32>
    %2 = arith.truncf %0 : vector<8x1033xf32> to vector<8x1033xbf16>
    %3 = arith.truncf %1 : vector<1033x50xf32> to vector<1033x50xbf16>
    %cst = arith.constant dense<0.000000e+00> : vector<8x50xf32>
    %4 = tpu.matmul %2, %3, %cst {dimension_numbers = #tpu.dot_dimension_numbers<[1], [0], [0], [1], [0, 0, 1, 1], [], []>} : vector<8x1033xbf16>, vector<1033x50xbf16>, vector<8x50xf32> -> vector<8x50xf32>
    %c0_3 = arith.constant 0 : index
    %c0_4 = arith.constant 0 : index
    %5 = vector.load %arg3[%c0_3, %c0_4] : memref<1x50xf32, #tpu.memory_space<vmem>>, vector<1x50xf32>
    %6 = vector.broadcast %5 : vector<1x50xf32> to vector<8x50xf32>
    %7 = arith.addf %4, %6 : vector<8x50xf32>
    %cst_5 = arith.constant 0.000000e+00 : f32
    %8 = vector.broadcast %cst_5 : f32 to vector<8x50xf32>
    %9 = arith.maximumf %7, %8 : vector<8x50xf32>
    %c0_6 = arith.constant 0 : index
    %c0_7 = arith.constant 0 : index
    %10 = vector.load %arg4[%c0_6, %c0_7] : memref<1x50xf32, #tpu.memory_space<vmem>>, vector<1x50xf32>
    %11 = vector.broadcast %10 : vector<1x50xf32> to vector<8x50xf32>
    %12 = arith.mulf %9, %11 : vector<8x50xf32>
    %cst_8 = arith.constant dense<0.000000e+00> : vector<8xf32>
    %13 = vector.multi_reduction <add>, %12, %cst_8 [1] : vector<8x50xf32> to vector<8xf32>
    %14 = vector.shape_cast %13 : vector<8xf32> to vector<8x1xf32>
    %c0_9 = arith.constant 0 : index
    %c0_10 = arith.constant 0 : index
    %15 = memref.load %arg5[%c0_9, %c0_10] : memref<1x1xf32, #tpu.memory_space<smem>>
    %16 = vector.broadcast %15 : f32 to vector<8x1xf32>
    %17 = arith.addf %14, %16 : vector<8x1xf32>
    %c0_11 = arith.constant 0 : index
    %c0_12 = arith.constant 0 : index
    %18 = vector.load %arg6[%c0_11, %c0_12] : memref<8x1xf32, #tpu.memory_space<vmem>>, vector<8x1xf32>
    tpu.vector_store %arg6[%c0_11, %c0_12], %17 {strides = array<i32>} : memref<8x1xf32, #tpu.memory_space<vmem>>, vector<8x1xf32>,
    return
  }
  func.func @transform_0(%arg0: i32) -> (i32, i32) {
    %c0_i32 = arith.constant 0 : i32
    %c0_i32_0 = arith.constant 0 : i32
    return %arg0, %c0_i32 : i32, i32
  }
  func.func @transform_1(%arg0: i32) -> (i32, i32) {
    %c0_i32 = arith.constant 0 : i32
    %c0_i32_0 = arith.constant 0 : i32
    %c0_i32_1 = arith.constant 0 : i32
    return %c0_i32, %c0_i32_0 : i32, i32
  }
  func.func @transform_2(%arg0: i32) -> (i32, i32) {
    %c0_i32 = arith.constant 0 : i32
    %c0_i32_0 = arith.constant 0 : i32
    %c0_i32_1 = arith.constant 0 : i32
    return %c0_i32, %c0_i32_0 : i32, i32
  }
  func.func @transform_3(%arg0: i32) -> (i32, i32) {
    %c0_i32 = arith.constant 0 : i32
    %c0_i32_0 = arith.constant 0 : i32
    %c0_i32_1 = arith.constant 0 : i32
    return %c0_i32, %c0_i32_0 : i32, i32
  }
  func.func @transform_4(%arg0: i32) -> (i32, i32) {
    %c0_i32 = arith.constant 0 : i32
    %c0_i32_0 = arith.constant 0 : i32
    %c0_i32_1 = arith.constant 0 : i32
    return %c0_i32, %c0_i32_0 : i32, i32
  }
  func.func @transform_5(%arg0: i32) -> (i32, i32) {
    %c0_i32 = arith.constant 0 : i32
    %c0_i32_0 = arith.constant 0 : i32
    return %arg0, %c0_i32 : i32, i32
  }
}

</mosaic_0001>

<bundles_post_ra>
// kernel: _widenet_pallas.1
= control target key start
LH: loop header
LB: loop body
LE: loop exit
PB: predicated region body
PF: predicated region fallthrough
CT: control target
= control target key end

     0   :  { %vm243_vm0 = vcmask 1043456   ;;  %vm244_vm1 = vcmask 1044480   ;;  %vm239_vm2 = vcmask 72704   ;;  %vm373_vm3 = vcmask 408576   ;;  %s851_s1 = inlined_call_operand.vmem [shape: f32[1033,50], index: 1, kind: input, shape index: {}]   ;;  %s852_s0 = inlined_call_operand.vmem [shape: f32[8,1033], index: 0, kind: input, shape index: {}]   ;;  %s853_s2 = inlined_call_operand.vmem [shape: f32[1,50], index: 2, kind: input, shape index: {}]   ;;  %s854_s3 = inlined_call_operand.vmem [shape: f32[1,50], index: 3, kind: input, shape index: {}]   ;;  %s855_s4 = inlined_call_operand.<no memory space> [shape: f32[1,1], index: 4, kind: input, shape index: {}]   ;;  %s856_s5 = inlined_call_operand.vmem [shape: f32[8,1], index: 5, kind: output, shape index: {}]  }
   0x1   :  { %v45_v0 = vld [vmem:[%s851_s1 + $0x70] sm:$0xff]  ;;  %v46_v1 = vld [vmem:[%s851_s1 + $0x78] sm:$0xff]  ;;  %v43_v11 = vld [vmem:[%s851_s1 + $0x60] sm:$0xff]  ;;  %vm380_vm4 = vcmask 7168  }
   0x2   :  { %v77_v2 = vld [vmem:[%s851_s1 + $0x170] sm:$0xff]  ;;  %v177_v3 = vpack.c.bf16 %v46_v1, %v45_v0  ;;  %v78_v4 = vld [vmem:[%s851_s1 + $0x178] sm:$0xff]  ;;  %v44_v13 = vld [vmem:[%s851_s1 + $0x68] sm:$0xff] }
   0x3   :  { %v93_v5 = vld [vmem:[%s851_s1 + $0x1f0] sm:$0xff]  ;;  %v94_v6 = vld [vmem:[%s851_s1 + $0x1f8] sm:$0xff]  ;;  %v193_v7 = vpack.c.bf16 %v78_v4, %v77_v2  ;;  %v75_v14 = vld [vmem:[%s851_s1 + $0x160] sm:$0xff]  ;;  %v176_v16 = vpack.c.bf16 %v44_v13, %v43_v11 }
   0x4   :  { %v201_v8 = vpack.c.bf16 %v94_v6, %v93_v5  ;;  %v61_v9 = vld [vmem:[%s851_s1 + $0xf0] sm:$0xff]  ;;  %v62_v10 = vld [vmem:[%s851_s1 + $0xf8] sm:$0xff]  ;;  %250 = vmatpush.bf16.msra.mxu0 %v177_v3  ;;  %v76_v15 = vld [vmem:[%s851_s1 + $0x168] sm:$0xff] }
   0x5   :  { %v185_v12 = vpack.c.bf16 %v62_v10, %v61_v9  ;;  %276 = vmatpush.bf16.msra.mxu2 %v193_v7  ;;  %v192_v17 = vpack.c.bf16 %v76_v15, %v75_v14  ;;  %v91_v18 = vld [vmem:[%s851_s1 + $0x1e0] sm:$0xff]  ;;  %v92_v19 = vld [vmem:[%s851_s1 + $0x1e8] sm:$0xff]  ;;  %v41_v23 = vld [vmem:[%s851_s1 + $0x50] sm:$0xff] }
   0x6   :  { %289 = vmatpush.bf16.msra.mxu3 %v201_v8  ;;  %v59_v20 = vld [vmem:[%s851_s1 + $0xe0] sm:$0xff]  ;;  %v200_v21 = vpack.c.bf16 %v92_v19, %v91_v18  ;;  %v60_v22 = vld [vmem:[%s851_s1 + $0xe8] sm:$0xff]  ;;  %v42_v24 = vld [vmem:[%s851_s1 + $0x58] sm:$0xff] }
   0x7   :  { %263 = vmatpush.bf16.msra.mxu1 %v185_v12  ;;  %v184_v25 = vpack.c.bf16 %v60_v22, %v59_v20  ;;  %v73_v26 = vld [vmem:[%s851_s1 + $0x150] sm:$0xff]  ;;  %v74_v27 = vld [vmem:[%s851_s1 + $0x158] sm:$0xff]  ;;  %v175_v29 = vpack.c.bf16 %v42_v24, %v41_v23  ;;  %v39_v35 = vld [vmem:[%s851_s1 + $0x40] sm:$0xff] }
   0x8   :  { %v89_v28 = vld [vmem:[%s851_s1 + $0x1d0] sm:$0xff]  ;;  %251 = vmatpush.bf16.msra.mxu0 %v176_v16  ;;  %v90_v30 = vld [vmem:[%s851_s1 + $0x1d8] sm:$0xff]  ;;  %v191_v33 = vpack.c.bf16 %v74_v27, %v73_v26  ;;  %v40_v36 = vld [vmem:[%s851_s1 + $0x48] sm:$0xff] }
   0x9   :  { %v57_v31 = vld [vmem:[%s851_s1 + $0xd0] sm:$0xff]  ;;  %v58_v32 = vld [vmem:[%s851_s1 + $0xd8] sm:$0xff]  ;;  %277 = vmatpush.bf16.msra.mxu2 %v192_v17  ;;  %v199_v34 = vpack.c.bf16 %v90_v30, %v89_v28  ;;  %v71_v37 = vld [vmem:[%s851_s1 + $0x140] sm:$0xff]  ;;  %v174_v44 = vpack.c.bf16 %v40_v36, %v39_v35 }
   0xa   :  { %290 = vmatpush.bf16.msra.mxu3 %v200_v21  ;;  %v183_v38 = vpack.c.bf16 %v58_v32, %v57_v31  ;;  %v72_v39 = vld [vmem:[%s851_s1 + $0x148] sm:$0xff]  ;;  %v87_v40 = vld [vmem:[%s851_s1 + $0x1c0] sm:$0xff]  ;;  %v37_v47 = vld [vmem:[%s851_s1 + $0x30] sm:$0xff] }
   0xb   :  { %264 = vmatpush.bf16.msra.mxu1 %v184_v25  ;;  %v88_v41 = vld [vmem:[%s851_s1 + $0x1c8] sm:$0xff]  ;;  %v55_v42 = vld [vmem:[%s851_s1 + $0xc0] sm:$0xff]  ;;  %v190_v45 = vpack.c.bf16 %v72_v39, %v71_v37  ;;  %v38_v48 = vld [vmem:[%s851_s1 + $0x38] sm:$0xff] }
   0xc   :  { %v56_v43 = vld [vmem:[%s851_s1 + $0xc8] sm:$0xff]  ;;  %252 = vmatpush.bf16.msra.mxu0 %v175_v29  ;;  %v198_v46 = vpack.c.bf16 %v88_v41, %v87_v40  ;;  %v69_v49 = vld [vmem:[%s851_s1 + $0x130] sm:$0xff]  ;;  %v70_v51 = vld [vmem:[%s851_s1 + $0x138] sm:$0xff]  ;;  %v173_v56 = vpack.c.bf16 %v38_v48, %v37_v47 }
   0xd   :  { %278 = vmatpush.bf16.msra.mxu2 %v191_v33  ;;  %v182_v50 = vpack.c.bf16 %v56_v43, %v55_v42  ;;  %v85_v52 = vld [vmem:[%s851_s1 + $0x1b0] sm:$0xff]  ;;  %v86_v53 = vld [vmem:[%s851_s1 + $0x1b8] sm:$0xff]  ;;  %v189_v57 = vpack.c.bf16 %v70_v51, %v69_v49  ;;  %v35_v59 = vld [vmem:[%s851_s1 + $0x20] sm:$0xff] }
   0xe   :  { %291 = vmatpush.bf16.msra.mxu3 %v199_v34  ;;  %v53_v54 = vld [vmem:[%s851_s1 + $0xb0] sm:$0xff]  ;;  %v54_v55 = vld [vmem:[%s851_s1 + $0xb8] sm:$0xff]  ;;  %v197_v58 = vpack.c.bf16 %v86_v53, %v85_v52  ;;  %v36_v60 = vld [vmem:[%s851_s1 + $0x28] sm:$0xff] }
   0xf   :  { %265 = vmatpush.bf16.msra.mxu1 %v183_v38  ;;  %v67_v61 = vld [vmem:[%s851_s1 + $0x120] sm:$0xff]  ;;  %v181_v62 = vpack.c.bf16 %v54_v55, %v53_v54  ;;  %v68_v63 = vld [vmem:[%s851_s1 + $0x128] sm:$0xff]  ;;  %v172_v4 = vpack.c.bf16 %v36_v60, %v35_v59  ;;  %v33_v7 = vld [vmem:[%s851_s1 + $0x10] sm:$0xff] }
  0x10   :  { %253 = vmatpush.bf16.msra.mxu0 %v174_v44  ;;  %v83_v0 = vld [vmem:[%s851_s1 + $0x1a0] sm:$0xff]  ;;  %v84_v1 = vld [vmem:[%s851_s1 + $0x1a8] sm:$0xff]  ;;  %v188_v5 = vpack.c.bf16 %v68_v63, %v67_v61  ;;  %v34_v8 = vld [vmem:[%s851_s1 + $0x18] sm:$0xff] }
  0x11   :  { %279 = vmatpush.bf16.msra.mxu2 %v190_v45  ;;  %v51_v2 = vld [vmem:[%s851_s1 + $0xa0] sm:$0xff]  ;;  %v52_v3 = vld [vmem:[%s851_s1 + $0xa8] sm:$0xff]  ;;  %v196_v6 = vpack.c.bf16 %v84_v1, %v83_v0  ;;  %v65_v9 = vld [vmem:[%s851_s1 + $0x110] sm:$0xff]  ;;  %v171_v16 = vpack.c.bf16 %v34_v8, %v33_v7 }
  0x12   :  { %292 = vmatpush.bf16.msra.mxu3 %v198_v46  ;;  %v180_v10 = vpack.c.bf16 %v52_v3, %v51_v2  ;;  %v66_v11 = vld [vmem:[%s851_s1 + $0x118] sm:$0xff]  ;;  %v81_v12 = vld [vmem:[%s851_s1 + $0x190] sm:$0xff]  ;;  %v31_v17 = vld [vmem:[%s851_s1] sm:$0xff] }
  0x13   :  { %266 = vmatpush.bf16.msra.mxu1 %v182_v50  ;;  %v82_v13 = vld [vmem:[%s851_s1 + $0x198] sm:$0xff]  ;;  %v49_v14 = vld [vmem:[%s851_s1 + $0x90] sm:$0xff]  ;;  %v32_v18 = vld [vmem:[%s851_s1 + $0x8] sm:$0xff]  ;;  %v187_v19 = vpack.c.bf16 %v66_v11, %v65_v9 }
  0x14   :  { %254 = vmatpush.bf16.msra.mxu0 %v173_v56  ;;  %v50_v15 = vld [vmem:[%s851_s1 + $0x98] sm:$0xff]  ;;  %v195_v20 = vpack.c.bf16 %v82_v13, %v81_v12  ;;  %v63_v21 = vld [vmem:[%s851_s1 + $0x100] sm:$0xff]  ;;  %v64_v22 = vld [vmem:[%s851_s1 + $0x108] sm:$0xff]  ;;  %v170_v31 = vpack.c.bf16 %v32_v18, %v31_v17 }
  0x15   :  { %280 = vmatpush.bf16.msra.mxu2 %v189_v57  ;;  %v79_v23 = vld [vmem:[%s851_s1 + $0x180] sm:$0xff]  ;;  %v179_v24 = vpack.c.bf16 %v50_v15, %v49_v14  ;;  %v80_v25 = vld [vmem:[%s851_s1 + $0x188] sm:$0xff]  ;;  %v109_v26 = vld [vmem:[%s851_s1 + $0x270] sm:$0xff]  ;;  %v186_v35 = vpack.c.bf16 %v64_v22, %v63_v21 }
  0x16   :  { %293 = vmatpush.bf16.msra.mxu3 %v197_v58  ;;  %v110_v27 = vld [vmem:[%s851_s1 + $0x278] sm:$0xff]  ;;  %v141_v28 = vld [vmem:[%s851_s1 + $0x370] sm:$0xff]  ;;  %v47_v33 = vld [vmem:[%s851_s1 + $0x80] sm:$0xff]  ;;  %v194_v36 = vpack.c.bf16 %v80_v25, %v79_v23 }
  0x17   :  { %267 = vmatpush.bf16.msra.mxu1 %v181_v62  ;;  %v142_v29 = vld [vmem:[%s851_s1 + $0x378] sm:$0xff]  ;;  %v157_v30 = vld [vmem:[%s851_s1 + $0x3f0] sm:$0xff]  ;;  %v48_v34 = vld [vmem:[%s851_s1 + $0x88] sm:$0xff]  ;;  %v209_v40 = vpack.c.bf16 %v110_v27, %v109_v26 }
  0x18   :  { %255 = vmatpush.bf16.msra.mxu0 %v172_v4  ;;  %v158_v32 = vld [vmem:[%s851_s1 + $0x3f8] sm:$0xff]  ;;  %v125_v37 = vld [vmem:[%s851_s1 + $0x2f0] sm:$0xff]  ;;  %v22_v39 = vld [vmem:[%s852_s0] sm:$0xff]  ;;  %v225_v41 = vpack.c.bf16 %v142_v29, %v141_v28  ;;  %v178_v44 = vpack.c.bf16 %v48_v34, %v47_v33 }
  0x19   :  { %281 = vmatpush.bf16.msra.mxu2 %v188_v5  ;;  %v126_v38 = vld [vmem:[%s851_s1 + $0x2f8] sm:$0xff]  ;;  %v107_v42 = vld [vmem:[%s851_s1 + $0x260] sm:$0xff]  ;;  %v233_v43 = vpack.c.bf16 %v158_v32, %v157_v30  ;;  %v108_v45 = vld [vmem:[%s851_s1 + $0x268] sm:$0xff]  ;;  %v161_v51 = vpack.c.bf16 %v22_v39, %v22_v39 }
  0x1a   :  { %294 = vmatpush.bf16.msra.mxu3 %v196_v6  ;;  %v139_v46 = vld [vmem:[%s851_s1 + $0x360] sm:$0xff]  ;;  %v140_v47 = vld [vmem:[%s851_s1 + $0x368] sm:$0xff]  ;;  %v217_v48 = vpack.c.bf16 %v126_v38, %v125_v37  ;;  %v24_v52 = vld [vmem:[%s852_s0 + $0x10] sm:$0xff]  ;;  %v208_v57 = vpack.c.bf16 %v108_v45, %v107_v42 }
  0x1b   :  { %268 = vmatpush.bf16.msra.mxu1 %v180_v10  ;;  %v155_v49 = vld [vmem:[%s851_s1 + $0x3e0] sm:$0xff]  ;;  %v156_v50 = vld [vmem:[%s851_s1 + $0x3e8] sm:$0xff]  ;;  %v163_v55 = vpack.c.bf16 %v24_v52, %v24_v52  ;;  %v25_v56 = vld [vmem:[%s852_s0 + $0x18] sm:$0xff]  ;;  %v224_v58 = vpack.c.bf16 %v140_v47, %v139_v46 }
  0x1c   :  { %256 = vmatpush.bf16.msra.mxu0 %v171_v16  ;;  %v123_v53 = vld [vmem:[%s851_s1 + $0x2e0] sm:$0xff]  ;;  %v124_v54 = vld [vmem:[%s851_s1 + $0x2e8] sm:$0xff]  ;;  %v105_v59 = vld [vmem:[%s851_s1 + $0x250] sm:$0xff]  ;;  %v164_v60 = vpack.c.bf16 %v25_v56, %v25_v56  ;;  %v232_v61 = vpack.c.bf16 %v156_v50, %v155_v49 }
  0x1d   :  { %282 = vmatpush.bf16.msra.mxu2 %v187_v19  ;;  %v106_v62 = vld [vmem:[%s851_s1 + $0x258] sm:$0xff]  ;;  %v137_v63 = vld [vmem:[%s851_s1 + $0x350] sm:$0xff]  ;;  %v216_v1 = vpack.c.bf16 %v124_v54, %v123_v53  ;;  %v23_v4 = vld [vmem:[%s852_s0 + $0x8] sm:$0xff] }
  0x1e   :  { %295 = vmatpush.bf16.msra.mxu3 %v195_v20  ;;  %v138_v0 = vld [vmem:[%s851_s1 + $0x358] sm:$0xff]  ;;  %v153_v2 = vld [vmem:[%s851_s1 + $0x3d0] sm:$0xff]  ;;  %v162_v7 = vpack.c.bf16 %v23_v4, %v23_v4  ;;  %v207_v8 = vpack.c.bf16 %v106_v62, %v105_v59  ;;  %v103_v10 = vld [vmem:[%s851_s1 + $0x240] sm:$0xff] }
  0x1f   :  { %269 = vmatpush.bf16.msra.mxu1 %v179_v24  ;;  %v154_v3 = vld [vmem:[%s851_s1 + $0x3d8] sm:$0xff]  ;;  %v121_v5 = vld [vmem:[%s851_s1 + $0x2d0] sm:$0xff]  ;;  %v223_v9 = vpack.c.bf16 %v138_v0, %v137_v63  ;;  %v104_v12 = vld [vmem:[%s851_s1 + $0x248] sm:$0xff] }
  0x20   :  { %257 = vmatpush.bf16.msra.mxu0 %v170_v31  ;;  %v122_v6 = vld [vmem:[%s851_s1 + $0x2d8] sm:$0xff]  ;;  %v231_v11 = vpack.c.bf16 %v154_v3, %v153_v2  ;;  %v135_v13 = vld [vmem:[%s851_s1 + $0x340] sm:$0xff]  ;;  %v136_v14 = vld [vmem:[%s851_s1 + $0x348] sm:$0xff]  ;;  %v206_v20 = vpack.c.bf16 %v104_v12, %v103_v10 }
  0x21   :  { %283 = vmatpush.bf16.msra.mxu2 %v186_v35  ;;  %v215_v15 = vpack.c.bf16 %v122_v6, %v121_v5  ;;  %v151_v16 = vld [vmem:[%s851_s1 + $0x3c0] sm:$0xff]  ;;  %v152_v17 = vld [vmem:[%s851_s1 + $0x3c8] sm:$0xff]  ;;  %v222_v21 = vpack.c.bf16 %v136_v14, %v135_v13  ;;  %v101_v22 = vld [vmem:[%s851_s1 + $0x230] sm:$0xff] }
  0x22   :  { %296 = vmatpush.bf16.msra.mxu3 %v194_v36  ;;  %v119_v18 = vld [vmem:[%s851_s1 + $0x2c0] sm:$0xff]  ;;  %v120_v19 = vld [vmem:[%s851_s1 + $0x2c8] sm:$0xff]  ;;  %v230_v23 = vpack.c.bf16 %v152_v17, %v151_v16  ;;  %v102_v24 = vld [vmem:[%s851_s1 + $0x238] sm:$0xff] }
  0x23   :  { %270 = vmatpush.bf16.msra.mxu1 %v178_v44  ;;  %258 = vmatmul.bf16.vlgmr.msra.gmra.mxu0 %v161_v51  ;;  %v133_v25 = vld [vmem:[%s851_s1 + $0x330] sm:$0xff]  ;;  %v134_v26 = vld [vmem:[%s851_s1 + $0x338] sm:$0xff]  ;;  %v214_v27 = vpack.c.bf16 %v120_v19, %v119_v18  ;;  %v205_v32 = vpack.c.bf16 %v102_v24, %v101_v22  ;;  %v99_v34 = vld [vmem:[%s851_s1 + $0x220] sm:$0xff] }
  0x24   :  { %302 = vmatpush.bf16.msrb.mxu0 %v209_v40  ;;  %284 = vmatmul.bf16.vlgmr.msra.gmra.mxu2 %v163_v55  ;;  %v149_v28 = vld [vmem:[%s851_s1 + $0x3b0] sm:$0xff]  ;;  %v150_v29 = vld [vmem:[%s851_s1 + $0x3b8] sm:$0xff]  ;;  %v221_v33 = vpack.c.bf16 %v134_v26, %v133_v25  ;;  %v100_v35 = vld [vmem:[%s851_s1 + $0x228] sm:$0xff] }
  0x25   :  { %328 = vmatpush.bf16.msrb.mxu2 %v225_v41  ;;  %297 = vmatmul.bf16.vlgmr.msra.gmra.mxu3 %v164_v60  ;;  %v117_v30 = vld [vmem:[%s851_s1 + $0x2b0] sm:$0xff]  ;;  %v118_v31 = vld [vmem:[%s851_s1 + $0x2b8] sm:$0xff]  ;;  %v229_v36 = vpack.c.bf16 %v150_v29, %v149_v28  ;;  %v131_v37 = vld [vmem:[%s851_s1 + $0x320] sm:$0xff]  ;;  %v204_v44 = vpack.c.bf16 %v100_v35, %v99_v34 }
  0x26   :  { %341 = vmatpush.bf16.msrb.mxu3 %v233_v43  ;;  %271 = vmatmul.bf16.vlgmr.msra.gmra.mxu1 %v162_v7  ;;  %v132_v38 = vld [vmem:[%s851_s1 + $0x328] sm:$0xff]  ;;  %v213_v39 = vpack.c.bf16 %v118_v31, %v117_v30  ;;  %v147_v40 = vld [vmem:[%s851_s1 + $0x3a0] sm:$0xff]  ;;  %v97_v46 = vld [vmem:[%s851_s1 + $0x210] sm:$0xff] }
  0x27   :  { %315 = vmatpush.bf16.msrb.mxu1 %v217_v48  ;;  %v148_v41 = vld [vmem:[%s851_s1 + $0x3a8] sm:$0xff]  ;;  %v115_v42 = vld [vmem:[%s851_s1 + $0x2a0] sm:$0xff]  ;;  %v220_v45 = vpack.c.bf16 %v132_v38, %v131_v37  ;;  %v98_v47 = vld [vmem:[%s851_s1 + $0x218] sm:$0xff] }
  0x28   :  { %303 = vmatpush.bf16.msrb.mxu0 %v208_v57  ;;  %v116_v43 = vld [vmem:[%s851_s1 + $0x2a8] sm:$0xff]  ;;  %v228_v48 = vpack.c.bf16 %v148_v41, %v147_v40  ;;  %v129_v49 = vld [vmem:[%s851_s1 + $0x310] sm:$0xff]  ;;  %v130_v50 = vld [vmem:[%s851_s1 + $0x318] sm:$0xff]  ;;  %v203_v60 = vpack.c.bf16 %v98_v47, %v97_v46 }
  0x29   :  { %329 = vmatpush.bf16.msrb.mxu2 %v224_v58  ;;  %v145_v51 = vld [vmem:[%s851_s1 + $0x390] sm:$0xff]  ;;  %v212_v52 = vpack.c.bf16 %v116_v43, %v115_v42  ;;  %v146_v53 = vld [vmem:[%s851_s1 + $0x398] sm:$0xff]  ;;  %v159_v54 = vld [vmem:[%s851_s1 + $0x400] sm:$0xff]  ;;  %v390_v58 = vmov 65535  }
  0x2a   :  { %342 = vmatpush.bf16.msrb.mxu3 %v232_v61  ;;  %v160_v55 = vld [vmem:[%s851_s1 + $0x408] sm:$0x1]  ;;  %v113_v56 = vld [vmem:[%s851_s1 + $0x290] sm:$0xff]  ;;  %v114_v57 = vld [vmem:[%s851_s1 + $0x298] sm:$0xff]  ;;  %v245_v59 = vsel %vm243_vm0, 4294967295, %v390_v58  ;;  %v219_v61 = vpack.c.bf16 %v130_v50, %v129_v49  ;;  %v227_v63 = vpack.c.bf16 %v146_v53, %v145_v51 }
  0x2b   :  { %316 = vmatpush.bf16.msrb.mxu1 %v216_v1  ;;  %v95_v62 = vld [vmem:[%s851_s1 + $0x200] sm:$0xff]  ;;  %v96_v0 = vld [vmem:[%s851_s1 + $0x208] sm:$0xff]  ;;  %v234_v3 = vpack.c.bf16 %v160_v55, %v159_v54  ;;  %v211_v4 = vpack.c.bf16 %v114_v57, %v113_v56  ;;  %v246_v7 = vsel %vm244_vm1, %v245_v59, 0  ;;  %v28_v13 = vld [vmem:[%s852_s0 + $0x30] sm:$0xff]  ;;  %v378_v57 = vstv %s855_s4 }
  0x2c   :  { %304 = vmatpush.bf16.msrb.mxu0 %v207_v8  ;;  %v127_v1 = vld [vmem:[%s851_s1 + $0x300] sm:$0xff]  ;;  %v128_v2 = vld [vmem:[%s851_s1 + $0x308] sm:$0xff]  ;;  %v202_v10 = vpack.c.bf16 %v96_v0, %v95_v62 }
  0x2d   :  { %330 = vmatpush.bf16.msrb.mxu2 %v223_v9  ;;  %v143_v5 = vld [vmem:[%s851_s1 + $0x380] sm:$0xff]  ;;  %v144_v6 = vld [vmem:[%s851_s1 + $0x388] sm:$0xff]  ;;  %v248_v16 = vand.u32 %v246_v7, %v234_v3 }
  0x2e   :  { %343 = vmatpush.bf16.msrb.mxu3 %v231_v11  ;;  %v111_v8 = vld [vmem:[%s851_s1 + $0x280] sm:$0xff]  ;;  %v112_v9 = vld [vmem:[%s851_s1 + $0x288] sm:$0xff]  ;;  %v218_v11 = vpack.c.bf16 %v128_v2, %v127_v1  ;;  %v226_v14 = vpack.c.bf16 %v144_v6, %v143_v5 }
  0x2f   :  { %317 = vmatpush.bf16.msrb.mxu1 %v215_v15  ;;  %v26_v12 = vld [vmem:[%s852_s0 + $0x20] sm:$0xff]  ;;  %v29_v15 = vld [vmem:[%s852_s0 + $0x38] sm:$0xff]  ;;  %v210_v17 = vpack.c.bf16 %v112_v9, %v111_v8  ;;  %v27_v18 = vld [vmem:[%s852_s0 + $0x28] sm:$0xff] }
  0x30   :  { %305 = vmatpush.bf16.msrb.mxu0 %v206_v20  ;;  %v165_v19 = vpack.c.bf16 %v26_v12, %v26_v12  ;;  %v167_v20 = vpack.c.bf16 %v28_v13, %v28_v13  ;;  %v166_v22 = vpack.c.bf16 %v27_v18, %v27_v18 }
  0x31   :  { %331 = vmatpush.bf16.msrb.mxu2 %v222_v21  ;;  %v168_v21 = vpack.c.bf16 %v29_v15, %v29_v15 }
  0x32   :  { %344 = vmatpush.bf16.msrb.mxu3 %v230_v23  ;;  %v30_v23 = vld [vmem:[%s852_s0 + $0x40] sm:$0xff] }
  0x33   :  { %318 = vmatpush.bf16.msrb.mxu1 %v214_v27  ;;  %v169_v24 = vpack.c.bf16 %v30_v23, %v30_v23 }
  0x34   :  { %306 = vmatpush.bf16.msrb.mxu0 %v205_v32 }
  0x35   :  { %332 = vmatpush.bf16.msrb.mxu2 %v221_v33  ;;  %v388_v33 = vld [vmem:[%s853_s2] ss:$0 sm:$0xff] }
  0x36   :  { %345 = vmatpush.bf16.msrb.mxu3 %v229_v36 }
  0x37   :  { %319 = vmatpush.bf16.msrb.mxu1 %v213_v39 }
  0x38   :  { %307 = vmatpush.bf16.msrb.mxu0 %v204_v44 }
  0x39   :  { %333 = vmatpush.bf16.msrb.mxu2 %v220_v45 }
  0x3a   :  { %346 = vmatpush.bf16.msrb.mxu3 %v228_v48 }
  0x3b   :  { %320 = vmatpush.bf16.msrb.mxu1 %v212_v52  ;;  %v389_v52 = vld [vmem:[%s854_s3] ss:$0 sm:$0xff] }
  0x3c   :  { %308 = vmatpush.bf16.msrb.mxu0 %v203_v60 }
  0x3d   :  { %334 = vmatpush.bf16.msrb.mxu2 %v219_v61 }
  0x3e   :  { %347 = vmatpush.bf16.msrb.mxu3 %v227_v63 }
  0x3f   :  { %321 = vmatpush.bf16.msrb.mxu1 %v211_v4 }
  0x40   :  { %309 = vmatpush.bf16.msrb.mxu0 %v202_v10 }
  0x41   :  { %335 = vmatpush.bf16.msrb.mxu2 %v218_v11 }
  0x42   :  { %348 = vmatpush.bf16.msrb.mxu3 %v226_v14 }
  0x43   :  { %322 = vmatpush.bf16.msrb.mxu1 %v210_v17  ;;  %310 = vmatmul.bf16.vlgmr.msrb.gmra.mxu0 %v165_v19 }
  0x44   :  { %361 = vmatpush.bf16.msra.mxu0 %v248_v16  ;;  %336 = vmatmul.bf16.vlgmr.msrb.gmra.mxu2 %v167_v20 }
  0x45   :  { %349 = vmatmul.bf16.vlgmr.msrb.gmra.mxu3 %v168_v21 }
  0x46   :  { %323 = vmatmul.bf16.vlgmr.msrb.gmra.mxu1 %v166_v22 }
  0x53   :  { %386 = vmatmul.msk.bf16.vlgmr.msra.gmra.mxu0 %vm239_vm2, %v169_v24 }
  0xa0   :  { %v259_v25 = vpop.f32.mrf.mxu0 }
  0xa1   :  { %v260_v34 = vadd.f32 %v388_v33, %v259_v25 }
  0xa3   :  { %v272_v26 = vpop.f32.mrf.mxu1 }
  0xa4   :  { %v273_v35 = vadd.f32 %v272_v26, %v260_v34 }
  0xa7   :  { %v285_v27 = vpop.f32.mrf.mxu2 }
  0xa8   :  { %v298_v28 = vpop.f32.mrf.mxu3  ;;  %v261_v29 = vpop.f32.mrf.mxu0  ;;  %v286_v36 = vadd.f32 %v285_v27, %v273_v35 }
  0xaa   :  { %v299_v39 = vadd.f32 %v298_v28, %v286_v36 }
  0xab   :  { %v274_v30 = vpop.f32.mrf.mxu1 }
  0xaf   :  { %v287_v31 = vpop.f32.mrf.mxu2 }
  0xb0   :  { %v300_v32 = vpop.f32.mrf.mxu3 }
  0xc0   :  { %v311_v37 = vpop.f32.mrf.mxu0 }
  0xc1   :  { %v312_v40 = vadd.f32 %v311_v37, %v299_v39 }
  0xc3   :  { %v324_v38 = vpop.f32.mrf.mxu1 }
  0xc4   :  { %v325_v44 = vadd.f32 %v324_v38, %v312_v40 }
  0xc7   :  { %v337_v41 = vpop.f32.mrf.mxu2 }
  0xc8   :  { %v350_v42 = vpop.f32.mrf.mxu3  ;;  %v313_v43 = vpop.f32.mrf.mxu0  ;;  %v338_v46 = vadd.f32 %v337_v41, %v325_v44 }
  0xca   :  { %v351_v48 = vadd.f32 %v350_v42, %v338_v46 }
  0xcb   :  { %v326_v45 = vpop.f32.mrf.mxu1 }
  0xcf   :  { %v339_v47 = vpop.f32.mrf.mxu2 }
  0xd0   :  { %v352_v49 = vpop.f32.mrf.mxu3  ;;  %v363_v50 = vpop.f32.mrf.mxu0 }
  0xd1   :  { %v364_v51 = vadd.f32 %v363_v50, %v351_v48 }
  0xd3   :  { %v367_v53 = vmax.f32 %v364_v51, 0.0 }
  0xd5   :  { %v372_v54 = vmul.f32 %v389_v52, %v367_v53 }
  0xd7   :  { %v374_v55 = vsel %vm373_vm3, %v372_v54, 0.0 }
  0xd8   :  { %v365_v56 = vpop.f32.mrf.mxu0  ;;  %375 = vadd.xlane.f32.xlu0 %v374_v55 }
 0x14b   :  { %v376_v58 = vpop.xlane.xlu0 %375 }
 0x14c   :  { %v379_v59 = vadd.f32 %v378_v57, %v376_v58 }
 0x14e   :  { %381 = vst.msk [vmem:[%s856_s5] sm:$0xff] %vm380_vm4, %v379_v59 }

</bundles_post_ra>
